<compile_context>
chip_gen: v6e
topology: v6e:2x2x1
jax: 0.10.0
libtpu: 0.0.40
codegen_flags: <defaults>
</compile_context>

<pallas_src>
import functools

import numpy as np
import jax
import jax.numpy as jnp
from jax import lax
from jax.experimental import pallas as pl
from jax.experimental.pallas import tpu as pltpu


def _basic_block_kernel(x_ref, m1_ref, s1_ref, b1_ref, m2_ref, s2_ref, b2_ref,
                        o_ref, *, mxu_dtype, precision):
  """One grid step: `nb` images, each an (H, W*C [padded to 128k]) slab.

  x_ref  : (nb, H, WCp)    input rows, (W, C) flattened + zero-padded on lanes
  m1_ref : (3, WCp, WCp)   conv1 banded matrices, one per vertical tap dy
  s1/b1  : (1, WCp)        folded BN1 scale / bias (per channel, tiled over W)
  m2_ref : (3, WCp, WCp)   conv2 banded matrices
  s2/b2  : (1, WCp)        folded BN2 scale / bias
  o_ref  : (nb, H, WCp)
  """
  nb, h, wc = x_ref.shape
  rows = nb * h

  def dot32(a, b):
    return jnp.dot(a.astype(mxu_dtype), b,
                   preferred_element_type=jnp.float32, precision=precision)

  # Per-image row index -> border masks for the vertical taps.  Masking with
  # (row % h) keeps images independent when batch_block > 1 (no cross-image
  # leakage through the roll wrap-around).
  in_img = lax.broadcasted_iota(jnp.int32, (rows, wc), 0) % h
  top = in_img == 0          # rows with no y-1 neighbor inside the image
  bot = in_img == h - 1      # rows with no y+1 neighbor inside the image

  def conv3x3(lhs, m_ref):
    # lhs: (rows, wc) f32.  Vertical +-1 row shifts via sublane roll (XLU
    # slot) with zero fill at image borders (VPU) — no MXU work, no scratch.
    lhs_dn = jnp.where(top, 0.0, pltpu.roll(lhs, 1, axis=0))         # lhs[y-1]
    lhs_up = jnp.where(bot, 0.0, pltpu.roll(lhs, rows - 1, axis=0))  # lhs[y+1]
    return (dot32(lhs, m_ref[1]) +       # dy = 0 tap (center row)
            dot32(lhs_dn, m_ref[0]) +    # dy = -1 tap
            dot32(lhs_up, m_ref[2]))     # dy = +1 tap

  x = x_ref[...].reshape(rows, wc)                            # f32
  h1 = conv3x3(x, m1_ref)                                     # conv1 (f32 acc)
  h1 = jnp.maximum(h1 * s1_ref[...] + b1_ref[...], 0.0)       # bn1 + relu
  h2 = conv3x3(h1, m2_ref)                                    # conv2
  # Residual: re-read the x block in the epilogue (cheap vld; nothing held
  # live across both convs).
  res = x_ref[...].reshape(rows, wc).astype(jnp.float32)
  out = jnp.maximum(h2 * s2_ref[...] + b2_ref[...] + res, 0.0)  # bn2+add+relu
  o_ref[...] = out.reshape(nb, h, wc).astype(o_ref.dtype)


def _conv_band_matrices(w_hwio, width):
  """(3, 3, Cin, Cout) HWIO -> (3, width*Cin, width*Cout) banded matrices.

  mats[dy][(x+dx-1)*Cin + ci, x*Cout + co] = w_hwio[dy, dx, ci, co]; entries
  whose input column x+dx-1 falls outside [0, width) are dropped, which
  implements the horizontal zero padding of the conv.
  """
  mats = []
  for dy in range(3):
    m = 0.0
    for dx in range(3):
      shift = jnp.eye(width, k=-(dx - 1), dtype=w_hwio.dtype)
      m = m + jnp.kron(shift, w_hwio[dy, dx])
    mats.append(m)
  return jnp.stack(mats, axis=0)


@functools.partial(jax.jit, static_argnames=("mxu_dtype", "batch_block"))
def basic_block_pallas(x_nchw, w1, s1, b1, w2, s2, b2, *,
                       mxu_dtype=jnp.bfloat16, batch_block=1):
  """ResNet BasicBlock forward (stride=1, no downsample), BN folded.

  x_nchw : (N, C, H, W) float32
  w1, w2 : (3, 3, Cin, Cout) HWIO conv weights (Cin == Cout == C)
  s*, b* : (C,) folded BatchNorm scale / bias
  """
  N, C, H, W = x_nchw.shape
  if N % batch_block != 0:
    raise ValueError("batch_block must divide N")
  nb = batch_block
  wc = W * C
  wc_pad = ((wc + 127) // 128) * 128   # lane-dense: pad W*C to a multiple of 128

  use_f32 = np.dtype(mxu_dtype) == np.dtype(np.float32)
  precision = lax.Precision.HIGHEST if use_f32 else lax.Precision.DEFAULT

  # NCHW -> (N, H, W*C) rows, zero-padded on the lane axis.  Padded lanes have
  # zero weights / scale / bias, so they stay exactly zero through the block.
  x_rows = jnp.transpose(x_nchw, (0, 2, 3, 1)).reshape(N, H, wc)
  x_rows = jnp.pad(x_rows, ((0, 0), (0, 0), (0, wc_pad - wc)))

  def band(w):
    m = _conv_band_matrices(w, W).astype(mxu_dtype)
    return jnp.pad(m, ((0, 0), (0, wc_pad - wc), (0, wc_pad - wc)))

  def affine(v):
    r = jnp.tile(v.astype(jnp.float32), W)
    return jnp.pad(r, (0, wc_pad - wc)).reshape(1, wc_pad)

  m1p, m2p = band(w1), band(w2)
  s1r, b1r, s2r, b2r = affine(s1), affine(b1), affine(s2), affine(b2)

  kernel = functools.partial(_basic_block_kernel, mxu_dtype=mxu_dtype,
                             precision=precision)

  # Grid-invariant operands: single-buffered (no pointless double buffering).
  invariant = dict(pipeline_mode=pl.Buffered(buffer_count=1))

  out_rows = pl.pallas_call(
      kernel,
      out_shape=jax.ShapeDtypeStruct((N, H, wc_pad), x_nchw.dtype),
      grid_spec=pltpu.PrefetchScalarGridSpec(
          num_scalar_prefetch=0,
          grid=(N // nb,),
          in_specs=[
              pl.BlockSpec((nb, H, wc_pad), lambda n: (n, 0, 0)),
              pl.BlockSpec((3, wc_pad, wc_pad), lambda n: (0, 0, 0), **invariant),
              pl.BlockSpec((1, wc_pad), lambda n: (0, 0), **invariant),
              pl.BlockSpec((1, wc_pad), lambda n: (0, 0), **invariant),
              pl.BlockSpec((3, wc_pad, wc_pad), lambda n: (0, 0, 0), **invariant),
              pl.BlockSpec((1, wc_pad), lambda n: (0, 0), **invariant),
              pl.BlockSpec((1, wc_pad), lambda n: (0, 0), **invariant),
          ],
          out_specs=pl.BlockSpec((nb, H, wc_pad), lambda n: (n, 0, 0)),
      ),
      compiler_params=pltpu.CompilerParams(
          dimension_semantics=("parallel",),
          vmem_limit_bytes=32 * 1024 * 1024),
  )(x_rows, m1p, s1r, b1r, m2p, s2r, b2r)

  # (N, H, WCp) -> drop lane padding -> (N, H, W, C) -> NCHW
  out = out_rows[..., :wc].reshape(N, H, W, C)
  return jnp.transpose(out, (0, 3, 1, 2))


def _reference(x_nchw, w1, s1, b1, w2, s2, b2):
  """Pure-JAX reference (lax conv) for correctness checking."""
  def conv(x, w):
    return lax.conv_general_dilated(
        x, w, window_strides=(1, 1), padding=((1, 1), (1, 1)),
        dimension_numbers=("NCHW", "HWIO", "NCHW"),
        precision=lax.Precision.HIGHEST)
  h = conv(x_nchw, w1) * s1[None, :, None, None] + b1[None, :, None, None]
  h = jnp.maximum(h, 0.0)
  h = conv(h, w2) * s2[None, :, None, None] + b2[None, :, None, None]
  return jnp.maximum(h + x_nchw, 0.0)


if __name__ == "__main__":
  N, C, H, W = 2, 4, 16, 16   # inplanes = planes = 4, stride = 1
  key = jax.random.PRNGKey(0)
  (kx, kw1, kw2, kg1, kb1, km1, kv1, kg2, kb2, km2, kv2) = jax.random.split(key, 11)

  x = jax.random.normal(kx, (N, C, H, W), dtype=jnp.float32)
  w1 = jax.random.normal(kw1, (3, 3, C, C), dtype=jnp.float32) * 0.1
  w2 = jax.random.normal(kw2, (3, 3, C, C), dtype=jnp.float32) * 0.1

  # BatchNorm params (inference mode), folded to per-channel scale/bias.
  eps = 1e-5
  gamma1 = 1.0 + 0.1 * jax.random.normal(kg1, (C,), dtype=jnp.float32)
  beta1 = 0.1 * jax.random.normal(kb1, (C,), dtype=jnp.float32)
  mean1 = 0.1 * jax.random.normal(km1, (C,), dtype=jnp.float32)
  var1 = jnp.abs(jax.random.normal(kv1, (C,), dtype=jnp.float32)) + 0.5
  gamma2 = 1.0 + 0.1 * jax.random.normal(kg2, (C,), dtype=jnp.float32)
  beta2 = 0.1 * jax.random.normal(kb2, (C,), dtype=jnp.float32)
  mean2 = 0.1 * jax.random.normal(km2, (C,), dtype=jnp.float32)
  var2 = jnp.abs(jax.random.normal(kv2, (C,), dtype=jnp.float32)) + 0.5

  s1 = gamma1 / jnp.sqrt(var1 + eps)
  b1 = beta1 - mean1 * s1
  s2 = gamma2 / jnp.sqrt(var2 + eps)
  b2 = beta2 - mean2 * s2

  ref = _reference(x, w1, s1, b1, w2, s2, b2)

  # Default fast path: bf16 MXU operands / DEFAULT precision, batch_block=1
  # -> grid=(2,) on the "parallel" axis so both v7x TensorCores get work.
  out_bf16 = jax.block_until_ready(
      basic_block_pallas(x, w1, s1, b1, w2, s2, b2))
  assert out_bf16.shape == (N, C, H, W)
  assert jnp.allclose(out_bf16, ref, atol=5e-2, rtol=5e-2), "bf16 mismatch"

  # f32 + HIGHEST correctness-check path; batch_block=2 also exercises the
  # per-image border masks with two images packed into one grid step.
  out_f32 = jax.block_until_ready(
      basic_block_pallas(x, w1, s1, b1, w2, s2, b2,
                         mxu_dtype=jnp.float32, batch_block=2))
  assert jnp.allclose(out_f32, ref, atol=1e-4, rtol=1e-4), "f32 mismatch"

  print("KERNEL_OK")
</pallas_src>

<mosaic_0001>
module attributes {stable_mosaic.version = 11 : i64} {
  func.func @_basic_block_kernel(%arg0: i32, %arg1: memref<1x16x128xf32, #tpu.memory_space<vmem>>, %arg2: memref<3x128x128xbf16, #tpu.memory_space<vmem>>, %arg3: memref<1x128xf32, #tpu.memory_space<vmem>>, %arg4: memref<1x128xf32, #tpu.memory_space<vmem>>, %arg5: memref<3x128x128xbf16, #tpu.memory_space<vmem>>, %arg6: memref<1x128xf32, #tpu.memory_space<vmem>>, %arg7: memref<1x128xf32, #tpu.memory_space<vmem>>, %arg8: memref<1x16x128xf32, #tpu.memory_space<vmem>>) attributes {dimension_semantics = [#tpu.dimension_semantics<parallel>], iteration_bounds = array<i64: 2>, scalar_prefetch = 0 : i64, scratch_operands = 0 : i64, tpu.core_type = #tpu.core_type<tc>, window_params = [{transform_indices = @transform_0, window_bounds = array<i64: 1, 16, 128>}, {pipeline_mode = #tpu.pipeline_mode<synchronous>, transform_indices = @transform_1, window_bounds = array<i64: 3, 128, 128>}, {pipeline_mode = #tpu.pipeline_mode<synchronous>, transform_indices = @transform_2, window_bounds = array<i64: 1, 128>}, {pipeline_mode = #tpu.pipeline_mode<synchronous>, transform_indices = @transform_3, window_bounds = array<i64: 1, 128>}, {pipeline_mode = #tpu.pipeline_mode<synchronous>, transform_indices = @transform_4, window_bounds = array<i64: 3, 128, 128>}, {pipeline_mode = #tpu.pipeline_mode<synchronous>, transform_indices = @transform_5, window_bounds = array<i64: 1, 128>}, {pipeline_mode = #tpu.pipeline_mode<synchronous>, transform_indices = @transform_6, window_bounds = array<i64: 1, 128>}, {transform_indices = @transform_7, window_bounds = array<i64: 1, 16, 128>}]} {
    %0 = tpu.iota {dimensions = array<i32: 0>} : vector<16x128xi32>
    %c16_i32 = arith.constant 16 : i32
    %c0_i32 = arith.constant 0 : i32
    %1 = arith.cmpi eq, %c16_i32, %c0_i32 : i32
    %c1_i32 = arith.constant 1 : i32
    %2 = arith.select %1, %c1_i32, %c16_i32 : i32
    %3 = vector.broadcast %2 : i32 to vector<16x128xi32>
    %4 = arith.remsi %0, %3 : vector<16x128xi32>
    %c0_i32_0 = arith.constant 0 : i32
    %5 = vector.broadcast %c0_i32_0 : i32 to vector<16x128xi32>
    %6 = arith.cmpi ne, %4, %5 : vector<16x128xi32>
    %c0_i32_1 = arith.constant 0 : i32
    %7 = vector.broadcast %c0_i32_1 : i32 to vector<16x128xi32>
    %8 = arith.cmpi slt, %4, %7 : vector<16x128xi32>
    %c0_i32_2 = arith.constant 0 : i32
    %9 = arith.cmpi slt, %2, %c0_i32_2 : i32
    %10 = vector.broadcast %9 : i1 to vector<16x128xi1>
    %11 = vector.broadcast %10 : vector<16x128xi1> to vector<16x128xi1>
    %12 = arith.xori %8, %11 : vector<16x128xi1>
    %13 = arith.andi %12, %6 : vector<16x128xi1>
    %14 = vector.broadcast %2 : i32 to vector<16x128xi32>
    %15 = arith.addi %4, %14 : vector<16x128xi32>
    %16 = arith.select %13, %15, %4 : vector<16x128xi1>, vector<16x128xi32>
    %c0_i32_3 = arith.constant 0 : i32
    %17 = vector.broadcast %c0_i32_3 : i32 to vector<16x128xi32>
    %18 = arith.cmpi eq, %16, %17 : vector<16x128xi32>
    %c15_i32 = arith.constant 15 : i32
    %19 = vector.broadcast %c15_i32 : i32 to vector<16x128xi32>
    %20 = arith.cmpi eq, %16, %19 : vector<16x128xi32>
    %c0 = arith.constant 0 : index
    %c0_4 = arith.constant 0 : index
    %c0_5 = arith.constant 0 : index
    %21 = vector.load %arg1[%c0, %c0_4, %c0_5] : memref<1x16x128xf32, #tpu.memory_space<vmem>>, vector<1x16x128xf32>
    %22 = vector.shape_cast %21 : vector<1x16x128xf32> to vector<16x128xf32>
    %c1_i32_6 = arith.constant 1 : i32
    %23 = tpu.dynamic_rotate %22 by %c1_i32_6 dim 0 : vector<16x128xf32>, i32 -> vector<16x128xf32>
    %cst = arith.constant 0.000000e+00 : f32
    %24 = vector.broadcast %cst : f32 to vector<16x128xf32>
    %25 = arith.select %18, %24, %23 : vector<16x128xi1>, vector<16x128xf32>
    %c15_i32_7 = arith.constant 15 : i32
    %26 = tpu.dynamic_rotate %22 by %c15_i32_7 dim 0 : vector<16x128xf32>, i32 -> vector<16x128xf32>
    %cst_8 = arith.constant 0.000000e+00 : f32
    %27 = vector.broadcast %cst_8 : f32 to vector<16x128xf32>
    %28 = arith.select %20, %27, %26 : vector<16x128xi1>, vector<16x128xf32>
    %c1 = arith.constant 1 : index
    %c0_9 = arith.constant 0 : index
    %c0_10 = arith.constant 0 : index
    %29 = vector.load %arg2[%c1, %c0_9, %c0_10] : memref<3x128x128xbf16, #tpu.memory_space<vmem>>, vector<1x128x128xbf16>
    %30 = vector.shape_cast %29 : vector<1x128x128xbf16> to vector<128x128xbf16>
    %31 = arith.truncf %22 : vector<16x128xf32> to vector<16x128xbf16>
    %cst_11 = arith.constant dense<0.000000e+00> : vector<16x128xf32>
    %32 = tpu.matmul %31, %30, %cst_11 {dimension_numbers = #tpu.dot_dimension_numbers<[1], [0], [0], [1], [0, 0, 1, 1], [], []>} : vector<16x128xbf16>, vector<128x128xbf16>, vector<16x128xf32> -> vector<16x128xf32>
    %c0_12 = arith.constant 0 : index
    %c0_13 = arith.constant 0 : index
    %c0_14 = arith.constant 0 : index
    %33 = vector.load %arg2[%c0_12, %c0_13, %c0_14] : memref<3x128x128xbf16, #tpu.memory_space<vmem>>, vector<1x128x128xbf16>
    %34 = vector.shape_cast %33 : vector<1x128x128xbf16> to vector<128x128xbf16>
    %35 = arith.truncf %25 : vector<16x128xf32> to vector<16x128xbf16>
    %cst_15 = arith.constant dense<0.000000e+00> : vector<16x128xf32>
    %36 = tpu.matmul %35, %34, %cst_15 {dimension_numbers = #tpu.dot_dimension_numbers<[1], [0], [0], [1], [0, 0, 1, 1], [], []>} : vector<16x128xbf16>, vector<128x128xbf16>, vector<16x128xf32> -> vector<16x128xf32>
    %37 = arith.addf %32, %36 : vector<16x128xf32>
    %c2 = arith.constant 2 : index
    %c0_16 = arith.constant 0 : index
    %c0_17 = arith.constant 0 : index
    %38 = vector.load %arg2[%c2, %c0_16, %c0_17] : memref<3x128x128xbf16, #tpu.memory_space<vmem>>, vector<1x128x128xbf16>
    %39 = vector.shape_cast %38 : vector<1x128x128xbf16> to vector<128x128xbf16>
    %40 = arith.truncf %28 : vector<16x128xf32> to vector<16x128xbf16>
    %cst_18 = arith.constant dense<0.000000e+00> : vector<16x128xf32>
    %41 = tpu.matmul %40, %39, %cst_18 {dimension_numbers = #tpu.dot_dimension_numbers<[1], [0], [0], [1], [0, 0, 1, 1], [], []>} : vector<16x128xbf16>, vector<128x128xbf16>, vector<16x128xf32> -> vector<16x128xf32>
    %42 = arith.addf %37, %41 : vector<16x128xf32>
    %c0_19 = arith.constant 0 : index
    %c0_20 = arith.constant 0 : index
    %43 = vector.load %arg3[%c0_19, %c0_20] : memref<1x128xf32, #tpu.memory_space<vmem>>, vector<1x128xf32>
    %44 = vector.broadcast %43 : vector<1x128xf32> to vector<16x128xf32>
    %45 = arith.mulf %42, %44 : vector<16x128xf32>
    %c0_21 = arith.constant 0 : index
    %c0_22 = arith.constant 0 : index
    %46 = vector.load %arg4[%c0_21, %c0_22] : memref<1x128xf32, #tpu.memory_space<vmem>>, vector<1x128xf32>
    %47 = vector.broadcast %46 : vector<1x128xf32> to vector<16x128xf32>
    %48 = arith.addf %45, %47 : vector<16x128xf32>
    %cst_23 = arith.constant 0.000000e+00 : f32
    %49 = vector.broadcast %cst_23 : f32 to vector<16x128xf32>
    %50 = arith.maximumf %48, %49 : vector<16x128xf32>
    %c1_i32_24 = arith.constant 1 : i32
    %51 = tpu.dynamic_rotate %50 by %c1_i32_24 dim 0 : vector<16x128xf32>, i32 -> vector<16x128xf32>
    %cst_25 = arith.constant 0.000000e+00 : f32
    %52 = vector.broadcast %cst_25 : f32 to vector<16x128xf32>
    %53 = arith.select %18, %52, %51 : vector<16x128xi1>, vector<16x128xf32>
    %c15_i32_26 = arith.constant 15 : i32
    %54 = tpu.dynamic_rotate %50 by %c15_i32_26 dim 0 : vector<16x128xf32>, i32 -> vector<16x128xf32>
    %cst_27 = arith.constant 0.000000e+00 : f32
    %55 = vector.broadcast %cst_27 : f32 to vector<16x128xf32>
    %56 = arith.select %20, %55, %54 : vector<16x128xi1>, vector<16x128xf32>
    %c1_28 = arith.constant 1 : index
    %c0_29 = arith.constant 0 : index
    %c0_30 = arith.constant 0 : index
    %57 = vector.load %arg5[%c1_28, %c0_29, %c0_30] : memref<3x128x128xbf16, #tpu.memory_space<vmem>>, vector<1x128x128xbf16>
    %58 = vector.shape_cast %57 : vector<1x128x128xbf16> to vector<128x128xbf16>
    %59 = arith.truncf %50 : vector<16x128xf32> to vector<16x128xbf16>
    %cst_31 = arith.constant dense<0.000000e+00> : vector<16x128xf32>
    %60 = tpu.matmul %59, %58, %cst_31 {dimension_numbers = #tpu.dot_dimension_numbers<[1], [0], [0], [1], [0, 0, 1, 1], [], []>} : vector<16x128xbf16>, vector<128x128xbf16>, vector<16x128xf32> -> vector<16x128xf32>
    %c0_32 = arith.constant 0 : index
    %c0_33 = arith.constant 0 : index
    %c0_34 = arith.constant 0 : index
    %61 = vector.load %arg5[%c0_32, %c0_33, %c0_34] : memref<3x128x128xbf16, #tpu.memory_space<vmem>>, vector<1x128x128xbf16>
    %62 = vector.shape_cast %61 : vector<1x128x128xbf16> to vector<128x128xbf16>
    %63 = arith.truncf %53 : vector<16x128xf32> to vector<16x128xbf16>
    %cst_35 = arith.constant dense<0.000000e+00> : vector<16x128xf32>
    %64 = tpu.matmul %63, %62, %cst_35 {dimension_numbers = #tpu.dot_dimension_numbers<[1], [0], [0], [1], [0, 0, 1, 1], [], []>} : vector<16x128xbf16>, vector<128x128xbf16>, vector<16x128xf32> -> vector<16x128xf32>
    %65 = arith.addf %60, %64 : vector<16x128xf32>
    %c2_36 = arith.constant 2 : index
    %c0_37 = arith.constant 0 : index
    %c0_38 = arith.constant 0 : index
    %66 = vector.load %arg5[%c2_36, %c0_37, %c0_38] : memref<3x128x128xbf16, #tpu.memory_space<vmem>>, vector<1x128x128xbf16>
    %67 = vector.shape_cast %66 : vector<1x128x128xbf16> to vector<128x128xbf16>
    %68 = arith.truncf %56 : vector<16x128xf32> to vector<16x128xbf16>
    %cst_39 = arith.constant dense<0.000000e+00> : vector<16x128xf32>
    %69 = tpu.matmul %68, %67, %cst_39 {dimension_numbers = #tpu.dot_dimension_numbers<[1], [0], [0], [1], [0, 0, 1, 1], [], []>} : vector<16x128xbf16>, vector<128x128xbf16>, vector<16x128xf32> -> vector<16x128xf32>
    %70 = arith.addf %65, %69 : vector<16x128xf32>
    %c0_40 = arith.constant 0 : index
    %c0_41 = arith.constant 0 : index
    %c0_42 = arith.constant 0 : index
    %71 = vector.load %arg1[%c0_40, %c0_41, %c0_42] : memref<1x16x128xf32, #tpu.memory_space<vmem>>, vector<1x16x128xf32>
    %72 = vector.shape_cast %71 : vector<1x16x128xf32> to vector<16x128xf32>
    %c0_43 = arith.constant 0 : index
    %c0_44 = arith.constant 0 : index
    %73 = vector.load %arg6[%c0_43, %c0_44] : memref<1x128xf32, #tpu.memory_space<vmem>>, vector<1x128xf32>
    %74 = vector.broadcast %73 : vector<1x128xf32> to vector<16x128xf32>
    %75 = arith.mulf %70, %74 : vector<16x128xf32>
    %c0_45 = arith.constant 0 : index
    %c0_46 = arith.constant 0 : index
    %76 = vector.load %arg7[%c0_45, %c0_46] : memref<1x128xf32, #tpu.memory_space<vmem>>, vector<1x128xf32>
    %77 = vector.broadcast %76 : vector<1x128xf32> to vector<16x128xf32>
    %78 = arith.addf %75, %77 : vector<16x128xf32>
    %79 = arith.addf %78, %72 : vector<16x128xf32>
    %cst_47 = arith.constant 0.000000e+00 : f32
    %80 = vector.broadcast %cst_47 : f32 to vector<16x128xf32>
    %81 = arith.maximumf %79, %80 : vector<16x128xf32>
    %82 = vector.shape_cast %81 : vector<16x128xf32> to vector<1x16x128xf32>
    %c0_48 = arith.constant 0 : index
    %c0_49 = arith.constant 0 : index
    %c0_50 = arith.constant 0 : index
    %83 = vector.load %arg8[%c0_48, %c0_49, %c0_50] : memref<1x16x128xf32, #tpu.memory_space<vmem>>, vector<1x16x128xf32>
    tpu.vector_store %arg8[%c0_48, %c0_49, %c0_50], %82 {strides = array<i32>} : memref<1x16x128xf32, #tpu.memory_space<vmem>>, vector<1x16x128xf32>,
    return
  }
  func.func @transform_0(%arg0: i32) -> (i32, i32, i32) {
    %c0_i32 = arith.constant 0 : i32
    %c0_i32_0 = arith.constant 0 : i32
    %c0_i32_1 = arith.constant 0 : i32
    return %arg0, %c0_i32, %c0_i32_0 : i32, i32, i32
  }
  func.func @transform_1(%arg0: i32) -> (i32, i32, i32) {
    %c0_i32 = arith.constant 0 : i32
    %c0_i32_0 = arith.constant 0 : i32
    %c0_i32_1 = arith.constant 0 : i32
    %c0_i32_2 = arith.constant 0 : i32
    return %c0_i32, %c0_i32_0, %c0_i32_1 : i32, i32, i32
  }
  func.func @transform_2(%arg0: i32) -> (i32, i32) {
    %c0_i32 = arith.constant 0 : i32
    %c0_i32_0 = arith.constant 0 : i32
    %c0_i32_1 = arith.constant 0 : i32
    return %c0_i32, %c0_i32_0 : i32, i32
  }
  func.func @transform_3(%arg0: i32) -> (i32, i32) {
    %c0_i32 = arith.constant 0 : i32
    %c0_i32_0 = arith.constant 0 : i32
    %c0_i32_1 = arith.constant 0 : i32
    return %c0_i32, %c0_i32_0 : i32, i32
  }
  func.func @transform_4(%arg0: i32) -> (i32, i32, i32) {
    %c0_i32 = arith.constant 0 : i32
    %c0_i32_0 = arith.constant 0 : i32
    %c0_i32_1 = arith.constant 0 : i32
    %c0_i32_2 = arith.constant 0 : i32
    return %c0_i32, %c0_i32_0, %c0_i32_1 : i32, i32, i32
  }
  func.func @transform_5(%arg0: i32) -> (i32, i32) {
    %c0_i32 = arith.constant 0 : i32
    %c0_i32_0 = arith.constant 0 : i32
    %c0_i32_1 = arith.constant 0 : i32
    return %c0_i32, %c0_i32_0 : i32, i32
  }
  func.func @transform_6(%arg0: i32) -> (i32, i32) {
    %c0_i32 = arith.constant 0 : i32
    %c0_i32_0 = arith.constant 0 : i32
    %c0_i32_1 = arith.constant 0 : i32
    return %c0_i32, %c0_i32_0 : i32, i32
  }
  func.func @transform_7(%arg0: i32) -> (i32, i32, i32) {
    %c0_i32 = arith.constant 0 : i32
    %c0_i32_0 = arith.constant 0 : i32
    %c0_i32_1 = arith.constant 0 : i32
    return %arg0, %c0_i32, %c0_i32_0 : i32, i32, i32
  }
}

</mosaic_0001>

<bundles_post_ra>
// kernel: tile.33
= control target key start
LH: loop header
LB: loop body
LE: loop exit
PB: predicated region body
PF: predicated region fallthrough
CT: control target
= control target key end

     0   :  { %s28_s0 = inlined_call_operand.vmem [shape: f32[4], index: 0, kind: input, shape index: {}]   ;;  %s29_s1 = inlined_call_operand.vmem [shape: f32[16,4], index: 1, kind: output, shape index: {}]  }
   0x1   :  { %v4_v0 = vld [vmem:[%s28_s0] ss:$0 sm:$0xff] }
   0x2   :  { %5 = vst [vmem:[%s29_s1] sm:$0xff] %v4_v0  ;;  %8 = vst [vmem:[%s29_s1 + $0x8] sm:$0xff] %v4_v0 }

// kernel: tile.34
= control target key start
LH: loop header
LB: loop body
LE: loop exit
PB: predicated region body
PF: predicated region fallthrough
CT: control target
= control target key end

     0   :  { %s133_s10 = smov 60   ;;  %s134_s11 = smov 52   ;;  %vm3_vm0 = vcmask 31744   ;;  %vm9_vm1 = vcmask 523744   ;;  %vm15_vm2 = vcmask 490944   ;;  %vm21_vm3 = vcmask 458144   ;;  %s209_s0 = inlined_call_operand.vmem [shape: f32[16,4], index: 0, kind: input, shape index: {}]   ;;  %s210_s1 = inlined_call_operand.vmem [shape: f32[64], index: 1, kind: output, shape index: {}]  }
   0x1   :  { %v103_v0 = vld [vmem:[%s209_s0 + $0xf] sm:$0x1]   ;;  %v105_v1 = vld [vmem:[%s209_s0 + $0xd] sm:$0x1]   ;;  %v104_v2 = vld [vmem:[%s209_s0 + $0xe] sm:$0x1]  }
   0x2   :  { %7 = vrot.lane.b32.xlu0 %v103_v0, %s133_s10  ;;  %19 = vrot.lane.b32.xlu1 %v105_v1, %s134_s11  ;;  %v106_v3 = vld [vmem:[%s209_s0 + $0xc] sm:$0x1]   ;;  %s135_s16 = smov 56   ;;  %s136_s17 = smov 48   ;;  %v107_v4 = vld [vmem:[%s209_s0 + $0xb] sm:$0x1]  }
   0x3   :  { %v108_v5 = vld [vmem:[%s209_s0 + $0xa] sm:$0x1]   ;;  %v2_v6 = vld [vmem:[%s209_s0] sm:$0x1]   ;;  %s137_s24 = smov 44   ;;  %s138_s25 = smov 40  }
   0x4   :  { %4 = vst.msk [vmem:[#allocation0] sm:$0x1] %vm3_vm0, %v2_v6   ;;  %v109_v7 = vld [vmem:[%s209_s0 + $0x9] sm:$0x1]   ;;  %v110_v8 = vld [vmem:[%s209_s0 + $0x8] sm:$0x1]  }
   0x5   :  { %s139_s30 = smov 36   ;;  %s140_s2 = smov 32   ;;  %v111_v9 = vld [vmem:[%s209_s0 + $0x7] sm:$0x1]   ;;  %v112_v10 = vld [vmem:[%s209_s0 + $0x6] sm:$0x1]  }
   0x6   :  { %13 = vrot.lane.b32.xlu0 %v104_v2, %s135_s16  ;;  %25 = vrot.lane.b32.xlu1 %v106_v3, %s136_s17  ;;  %s141_s7 = smov 28   ;;  %s142_s8 = smov 24   ;;  %v113_v11 = vld [vmem:[%s209_s0 + $0x5] sm:$0x1]   ;;  %v114_v12 = vld [vmem:[%s209_s0 + $0x4] sm:$0x1]  }
   0x7   :  { %s143_s13 = smov 20   ;;  %s144_s14 = smov 16   ;;  %v115_v13 = vld [vmem:[%s209_s0 + $0x3] sm:$0x1]   ;;  %v116_v14 = vld [vmem:[%s209_s0 + $0x2] sm:$0x1]  }
   0x8   :  { %s145_s19 = smov 12   ;;  %s146_s20 = smov 8   ;;  %v117_v15 = vld [vmem:[%s209_s0 + $0x1] sm:$0x1]   ;;  %vm27_vm4 = vcmask 425344   ;;  %vm33_vm5 = vcmask 392544  }
   0x9   :  { %s147_s0 = smov 4   ;;  %vm39_vm6 = vcmask 359744   ;;  %vm45_vm7 = vcmask 326944   ;;  %vm51_vm8 = vcmask 294144   ;;  %vm57_vm9 = vcmask 261344  }
   0xa   :  { %31 = vrot.lane.b32.xlu0 %v107_v4, %s137_s24  ;;  %37 = vrot.lane.b32.xlu1 %v108_v5, %s138_s25  ;;  %vm63_vm10 = vcmask 228544   ;;  %vm69_vm11 = vcmask 195744   ;;  %vm75_vm12 = vcmask 162944   ;;  %vm81_vm13 = vcmask 130144  }
   0xb   :  { %vm87_vm14 = vcmask 97344   ;;  %vm93_vm15 = vcmask 64544  }
   0xe   :  { %43 = vrot.lane.b32.xlu0 %v109_v7, %s139_s30  ;;  %49 = vrot.lane.b32.xlu1 %v110_v8, %s140_s2 }
  0x12   :  { %55 = vrot.lane.b32.xlu0 %v111_v9, %s141_s7  ;;  %61 = vrot.lane.b32.xlu1 %v112_v10, %s142_s8 }
  0x16   :  { %67 = vrot.lane.b32.xlu0 %v113_v11, %s143_s13  ;;  %73 = vrot.lane.b32.xlu1 %v114_v12, %s144_s14 }
  0x1a   :  { %79 = vrot.lane.b32.xlu0 %v115_v13, %s145_s19  ;;  %85 = vrot.lane.b32.xlu1 %v116_v14, %s146_s20 }
  0x1e   :  { %91 = vrot.lane.b32.xlu0 %v117_v15, %s147_s0 }
  0x74   :  { %v8_v16 = vpop.permute.xlu0 %7   ;;  %v20_v17 = vpop.permute.xlu1 %19  }
  0x75   :  { %10 = vst.msk [vmem:[#allocation0] sm:$0x1] %vm9_vm1, %v8_v16  }
  0x78   :  { %v14_v18 = vpop.permute.xlu0 %13   ;;  %v26_v19 = vpop.permute.xlu1 %25  }
  0x79   :  { %16 = vst.msk [vmem:[#allocation0] sm:$0x1] %vm15_vm2, %v14_v18  }
  0x7a   :  { %22 = vst.msk [vmem:[#allocation0] sm:$0x1] %vm21_vm3, %v20_v17  }
  0x7b   :  { %28 = vst.msk [vmem:[#allocation0] sm:$0x1] %vm27_vm4, %v26_v19  }
  0x7c   :  { %v32_v20 = vpop.permute.xlu0 %31   ;;  %v38_v21 = vpop.permute.xlu1 %37  }
  0x7d   :  { %34 = vst.msk [vmem:[#allocation0] sm:$0x1] %vm33_vm5, %v32_v20  }
  0x7e   :  { %40 = vst.msk [vmem:[#allocation0] sm:$0x1] %vm39_vm6, %v38_v21  }
  0x80   :  { %v44_v22 = vpop.permute.xlu0 %43   ;;  %v50_v23 = vpop.permute.xlu1 %49  }
  0x81   :  { %46 = vst.msk [vmem:[#allocation0] sm:$0x1] %vm45_vm7, %v44_v22  }
  0x82   :  { %52 = vst.msk [vmem:[#allocation0] sm:$0x1] %vm51_vm8, %v50_v23  }
  0x84   :  { %v56_v24 = vpop.permute.xlu0 %55   ;;  %v62_v25 = vpop.permute.xlu1 %61  }
  0x85   :  { %58 = vst.msk [vmem:[#allocation0] sm:$0x1] %vm57_vm9, %v56_v24  }
  0x86   :  { %64 = vst.msk [vmem:[#allocation0] sm:$0x1] %vm63_vm10, %v62_v25  }
  0x88   :  { %v68_v26 = vpop.permute.xlu0 %67   ;;  %v74_v27 = vpop.permute.xlu1 %73  }
  0x89   :  { %70 = vst.msk [vmem:[#allocation0] sm:$0x1] %vm69_vm11, %v68_v26  }
  0x8a   :  { %76 = vst.msk [vmem:[#allocation0] sm:$0x1] %vm75_vm12, %v74_v27  }
  0x8c   :  { %v80_v28 = vpop.permute.xlu0 %79   ;;  %v86_v29 = vpop.permute.xlu1 %85  }
  0x8d   :  { %82 = vst.msk [vmem:[#allocation0] sm:$0x1] %vm81_vm13, %v80_v28  }
  0x8e   :  { %88 = vst.msk [vmem:[#allocation0] sm:$0x1] %vm87_vm14, %v86_v29  }
  0x90   :  { %v92_v30 = vpop.permute.xlu0 %91  }
  0x91   :  { %94 = vst.msk [vmem:[#allocation0] sm:$0x1] %vm93_vm15, %v92_v30  }
  0x98   :  { %v99_v31 = vld [vmem:[#allocation0] sm:$0x1] }
  0x99   :  { %102 = vst [vmem:[%s210_s1] sm:$0x1] %v99_v31 }

// kernel: basic_block_pallas.1
= control target key start
LH: loop header
LB: loop body
LE: loop exit
PB: predicated region body
PF: predicated region fallthrough
CT: control target
= control target key end

     0   :  { %s1513_s24 = smov 0   ;;  %s1805_s0 = inlined_call_operand.vmem [shape: f32[2,16,128], index: 0, kind: input, shape index: {}]   ;;  %s1806_s1 = inlined_call_operand.vmem [shape: bf16[3,128,128], index: 1, kind: input, shape index: {}]   ;;  %s1807_s2 = inlined_call_operand.vmem [shape: f32[1,128], index: 2, kind: input, shape index: {}]   ;;  %s1808_s3 = inlined_call_operand.vmem [shape: f32[1,128], index: 3, kind: input, shape index: {}]   ;;  %s1809_s4 = inlined_call_operand.vmem [shape: bf16[3,128,128], index: 4, kind: input, shape index: {}]   ;;  %s1810_s5 = inlined_call_operand.vmem [shape: f32[1,128], index: 5, kind: input, shape index: {}]   ;;  %s1811_s6 = inlined_call_operand.vmem [shape: f32[1,128], index: 6, kind: input, shape index: {}]   ;;  %s1812_s7 = inlined_call_operand.vmem [shape: f32[2,16,128], index: 7, kind: output, shape index: {}]  }
   0x1 LB: > { %s1082_s25 = sadd.s32 4294967295, %s1468_s24   ;;  %p1086_p0 = scmp.ge.s32.totalorder %s1468_s24, 1  ;;  %s1468_s24 = sphi %s1513_s24, %s17_s24  }
   0x2   : > { %p237_p1 = scmp.lt.s32.totalorder %s1468_s24, 3 }
   0x4   : > { %p238_p2 = pnand %p1086_p0, %p237_p1 }
   0x5   : > { %p269_p3 = scmp.lt.s32.totalorder (!%p238_p2), %s1082_s25, 1 }
   0x6   : > { %241 = sbr.rel (%p238_p2) target bundleno = 526 (0x20e), region = 48 }
   0xb   : > { %v1414_v0 = vld [vmem:[%s1806_s1 + $0x38] sm:$0xff]   ;;  %v1470_v1 = vmov 0.0   ;;  %v1416_v3 = vld [vmem:[%s1806_s1 + $0x30] sm:$0xff]   ;;  %vm1471_vm0 = vmmov 0   ;;  %v1418_v5 = vld [vmem:[%s1806_s1 + $0x28] sm:$0xff]   ;;  %s1818_s25 = smov (!%p269_p3, %s1082_s25), 1  ;;  %v280_v7 = vlaneseq }
   0xc   : > { %1283 = vmatprep.subr.bf16.mxu0 %v1470_v1  ;;  %1303 = vmatprep.subr.bf16.mxu1 %v1470_v1  ;;  %v1415_v2 = vld [vmem:[%s1806_s1 + $0x78] sm:$0xff]   ;;  %v1417_v4 = vld [vmem:[%s1806_s1 + $0x70] sm:$0xff]   ;;  %v1419_v6 = vld [vmem:[%s1806_s1 + $0x68] sm:$0xff]   ;;  %s1225_s19 = sshll.u32 %s1818_s25, 4  ;;  %vm1472_vm3 = vmmov 1  }
   0xd   : > { %1284 = vmatpush3.bf16.msra.mxu0 %v1414_v0  ;;  %1299 = vmatprep.mubr.msk.bf16.mxu0 %vm1471_vm0, %v1470_v1  ;;  %v1420_v8 = vld [vmem:[%s1806_s1 + $0x20] sm:$0xff]   ;;  %v1560_v10 = vshrl.u32 %v280_v7, 7  ;;  %v1422_v11 = vld [vmem:[%s1806_s1 + $0x18] sm:$0xff]   ;;  %s273_s28 = scalar_lea.vmem %s1805_s0, %s1225_s19  ;;  %v1424_v13 = vld [vmem:[%s1806_s1 + $0x10] sm:$0xff]   ;;  %s278_s12 = scalar_lea.vmem %s1812_s7, %s1225_s19 }
   0xe   : > { %1304 = vmatpush3.bf16.msra.mxu1 %v1415_v2  ;;  %1285 = vmatprep.subr.bf16.mxu0 %v1470_v1  ;;  %v1421_v9 = vld [vmem:[%s1806_s1 + $0x60] sm:$0xff]   ;;  %v1423_v12 = vld [vmem:[%s1806_s1 + $0x58] sm:$0xff]   ;;  %v1425_v15 = vld [vmem:[%s1806_s1 + $0x50] sm:$0xff]  }
   0xf   : > { %1305 = vmatprep.subr.bf16.mxu1 %v1470_v1  ;;  %1319 = vmatprep.mubr.msk.bf16.mxu1 %vm1471_vm0, %v1470_v1  ;;  %v287_v14 = vand.u32 15, %v1560_v10  ;;  %v1582_v16 = vld [vmem:[%s273_s28] sm:$0xff]  ;;  %v1585_v17 = vld [vmem:[%s273_s28 + $0x8] sm:$0xff]  ;;  %vm315_vm2 = vcmp.lt.s32.totalorder %v1560_v10, 1  ;;  %v1430_v27 = vld [vmem:[%s1806_s1 + $0xb8] sm:$0xff]   ;;  %v282_v35 = vadd.s32 8, %v1560_v10 }
  0x10   : > { %v1426_v18 = vld [vmem:[%s1806_s1 + $0x8] sm:$0xff]   ;;  %v313_v19 = vrot.slane %v1582_v16, 7  ;;  %v314_v20 = vrot.slane %v1585_v17, 7  ;;  %v1428_v22 = vld [vmem:[%s1806_s1] sm:$0xff]   ;;  %v344_v29 = vpack.c.bf16 %v1585_v17, %v1582_v16  ;;  %v1431_v30 = vld [vmem:[%s1806_s1 + $0xb0] sm:$0xff]   ;;  %v320_v37 = vrot.slane %v1582_v16, 1 }
  0x11   : > { %1286 = vmatpush3.bf16.msra.mxu0 %v1416_v3  ;;  %vm1227_vm1 = vcmp.ne.s32.totalorder %v287_v14, 0  ;;  %v1427_v21 = vld [vmem:[%s1806_s1 + $0x48] sm:$0xff]   ;;  %v1429_v23 = vld [vmem:[%s1806_s1 + $0x40] sm:$0xff]   ;;  %v1434_v33 = vld [vmem:[%s1806_s1 + $0x98] sm:$0xff]   ;;  %v321_v38 = vrot.slane %v1585_v17, 1  ;;  %v294_v39 = vand.u32 15, %v282_v35 }
  0x12   : > { %1306 = vmatpush3.bf16.msra.mxu1 %v1417_v4  ;;  %1287 = vmatprep.subr.bf16.mxu0 %v1470_v1  ;;  %vm1606_vm4 = vmpackc.low %vm1472_vm3, %vm1227_vm1  ;;  %v316_v25 = vsel %vm315_vm2, %v313_v19, %v314_v20  ;;  %v317_v26 = vsel %vm315_vm2, %v314_v20, %v313_v19  ;;  %v1432_v31 = vld [vmem:[%s1806_s1 + $0xa8] sm:$0xff]   ;;  %v1433_v32 = vld [vmem:[%s1806_s1 + $0xa0] sm:$0xff]   ;;  %vm322_vm5 = vcmp.lt.s32.totalorder %v1560_v10, 7 }
  0x13   : > { %1307 = vmatprep.subr.bf16.mxu1 %v1470_v1  ;;  %v1117_v28 = vpack.c.bf16 %v316_v25, %v317_v26  ;;  %v1435_v34 = vld [vmem:[%s1806_s1 + $0x90] sm:$0xff]   ;;  %v1436_v36 = vld [vmem:[%s1806_s1 + $0x88] sm:$0xff]   ;;  %v1437_v40 = vld [vmem:[%s1806_s1 + $0x80] sm:$0xff]   ;;  %v323_v41 = vsel %vm322_vm5, %v320_v37, %v321_v38  ;;  %v324_v42 = vsel %vm322_vm5, %v321_v38, %v320_v37  ;;  %vm1228_vm6 = vcmp.ne.s32.totalorder %v294_v39, 15 }
  0x14   : > { %v1153_v43 = vpack.c.bf16 %v324_v42, %v323_v41  ;;  %vm1666_vm7 = vmpackc.low %vm1228_vm6, %vm1472_vm3  ;;  %v1438_v45 = vld [vmem:[%s1809_s4 + $0x78] sm:$0xff]   ;;  %v1440_v47 = vld [vmem:[%s1809_s4 + $0x70] sm:$0xff]  }
  0x15   : > { %1288 = vmatpush3.bf16.msra.mxu0 %v1418_v5  ;;  %v1439_v46 = vld [vmem:[%s1809_s4 + $0x38] sm:$0xff]   ;;  %v1441_v48 = vld [vmem:[%s1809_s4 + $0x30] sm:$0xff]   ;;  %v1442_v49 = vld [vmem:[%s1809_s4 + $0x68] sm:$0xff]  }
  0x16   : > { %1308 = vmatpush3.bf16.msra.mxu1 %v1419_v6  ;;  %1289 = vmatprep.subr.bf16.mxu0 %v1470_v1  ;;  %v1443_v50 = vld [vmem:[%s1809_s4 + $0x28] sm:$0xff]   ;;  %v1444_v51 = vld [vmem:[%s1809_s4 + $0x60] sm:$0xff]   ;;  %v1446_v53 = vld [vmem:[%s1809_s4 + $0x58] sm:$0xff]  }
  0x17   : > { %1309 = vmatprep.subr.bf16.mxu1 %v1470_v1  ;;  %v1445_v52 = vld [vmem:[%s1809_s4 + $0x20] sm:$0xff]   ;;  %v1447_v54 = vld [vmem:[%s1809_s4 + $0x18] sm:$0xff]   ;;  %v1448_v55 = vld [vmem:[%s1809_s4 + $0x50] sm:$0xff]  }
  0x18   : > { %v1449_v56 = vld [vmem:[%s1809_s4 + $0x10] sm:$0xff]   ;;  %v1450_v57 = vld [vmem:[%s1809_s4 + $0x48] sm:$0xff]   ;;  %v1452_v59 = vld [vmem:[%s1809_s4 + $0x40] sm:$0xff]  }
  0x19   : > { %1290 = vmatpush3.bf16.msra.mxu0 %v1420_v8  ;;  %v1451_v58 = vld [vmem:[%s1809_s4 + $0x8] sm:$0xff]   ;;  %v1453_v60 = vld [vmem:[%s1809_s4] sm:$0xff]   ;;  %v1458_v35 = vld [vmem:[%s1809_s4 + $0x98] sm:$0xff]  }
  0x1a   : > { %1310 = vmatpush3.bf16.msra.mxu1 %v1421_v9  ;;  %1291 = vmatprep.subr.bf16.mxu0 %v1470_v1  ;;  %v1155_v8 = vld [vmem:[%s1807_s2] ss:$0 sm:$0xff]  ;;  %v1460_v37 = vld [vmem:[%s1809_s4 + $0x88] sm:$0xff]  }
  0x1b   : > { %1311 = vmatprep.subr.bf16.mxu1 %v1470_v1  ;;  %v1457_v24 = vld [vmem:[%s1809_s4 + $0xa0] sm:$0xff]  }
  0x1c   : > { %v1221_v10 = vld [vmem:[%s1810_s5] ss:$0 sm:$0xff] }
  0x1d   : > { %1292 = vmatpush3.bf16.msra.mxu0 %v1422_v11  ;;  %v1156_v11 = vld [vmem:[%s1808_s3] ss:$0 sm:$0xff] }
  0x1e   : > { %1312 = vmatpush3.bf16.msra.mxu1 %v1423_v12  ;;  %1293 = vmatprep.subr.bf16.mxu0 %v1470_v1  ;;  %v1222_v44 = vld [vmem:[%s1811_s6] ss:$0 sm:$0xff] }
  0x1f   : > { %1313 = vmatprep.subr.bf16.mxu1 %v1470_v1 }
  0x21   : > { %1294 = vmatpush3.bf16.msra.mxu0 %v1424_v13 }
  0x22   : > { %1314 = vmatpush3.bf16.msra.mxu1 %v1425_v15  ;;  %1295 = vmatprep.subr.bf16.mxu0 %v1470_v1 }
  0x23   : > { %1315 = vmatprep.subr.bf16.mxu1 %v1470_v1 }
  0x25   : > { %1296 = vmatpush3.bf16.msra.mxu0 %v1426_v18 }
  0x26   : > { %1316 = vmatpush3.bf16.msra.mxu1 %v1427_v21  ;;  %1297 = vmatprep.subr.bf16.mxu0 %v1470_v1 }
  0x27   : > { %1317 = vmatprep.subr.bf16.mxu1 %v1470_v1 }
  0x29   : > { %1298 = vmatpush3.bf16.msra.mxu0 %v1428_v22 }
  0x2a   : > { %1318 = vmatpush3.bf16.msra.mxu1 %v1429_v23  ;;  %1323 = vmatprep.subr.bf16.mxu0 %v1470_v1 }
  0x2b   : > { %1343 = vmatprep.subr.bf16.mxu1 %v1470_v1 }
  0x2c   : > { %1300 = vmatmul.mubr.msk.bf16.vlgmr.msra.gmra.mxu0 %vm1606_vm4, %v1117_v28 }
  0x2d   : > { %1320 = vmatmul.mubr.bf16.vlgmr.msra.gmra.mxu1 %v344_v29  ;;  %1324 = vmatpush3.bf16.msra.mxu0 %v1430_v27 }
  0x2e   : > { %1325 = vmatprep.subr.bf16.mxu0 %v1470_v1  ;;  %1339 = vmatprep.mubr.msk.bf16.mxu0 %vm1471_vm0, %v1470_v1 }
  0x2f   : > { %1359 = vmatprep.mubr.msk.bf16.mxu1 %vm1471_vm0, %v1470_v1  ;;  %1344 = vmatpush3.bf16.msra.mxu1 %v1439_v46 }
  0x30   : > { %1345 = vmatprep.subr.bf16.mxu1 %v1470_v1 }
  0x31   : > { %1326 = vmatpush3.bf16.msra.mxu0 %v1431_v30 }
  0x32   : > { %1327 = vmatprep.subr.bf16.mxu0 %v1470_v1 }
  0x33   : > { %1346 = vmatpush3.bf16.msra.mxu1 %v1441_v48 }
  0x34   : > { %1347 = vmatprep.subr.bf16.mxu1 %v1470_v1 }
  0x35   : > { %1328 = vmatpush3.bf16.msra.mxu0 %v1432_v31  ;;  %v1454_v31 = vld [vmem:[%s1809_s4 + $0xb8] sm:$0xff]  }
  0x36   : > { %1329 = vmatprep.subr.bf16.mxu0 %v1470_v1 }
  0x37   : > { %1348 = vmatpush3.bf16.msra.mxu1 %v1443_v50 }
  0x38   : > { %1349 = vmatprep.subr.bf16.mxu1 %v1470_v1 }
  0x39   : > { %1330 = vmatpush3.bf16.msra.mxu0 %v1433_v32 }
  0x3a   : > { %1331 = vmatprep.subr.bf16.mxu0 %v1470_v1 }
  0x3b   : > { %1350 = vmatpush3.bf16.msra.mxu1 %v1445_v52 }
  0x3c   : > { %1351 = vmatprep.subr.bf16.mxu1 %v1470_v1 }
  0x3d   : > { %1332 = vmatpush3.bf16.msra.mxu0 %v1434_v33  ;;  %v1455_v33 = vld [vmem:[%s1809_s4 + $0xb0] sm:$0xff]  }
  0x3e   : > { %1333 = vmatprep.subr.bf16.mxu0 %v1470_v1 }
  0x3f   : > { %1352 = vmatpush3.bf16.msra.mxu1 %v1447_v54 }
  0x40   : > { %1353 = vmatprep.subr.bf16.mxu1 %v1470_v1 }
  0x41   : > { %1334 = vmatpush3.bf16.msra.mxu0 %v1435_v34  ;;  %v1456_v34 = vld [vmem:[%s1809_s4 + $0xa8] sm:$0xff]  }
  0x42   : > { %1335 = vmatprep.subr.bf16.mxu0 %v1470_v1 }
  0x43   : > { %1354 = vmatpush3.bf16.msra.mxu1 %v1449_v56 }
  0x44   : > { %1355 = vmatprep.subr.bf16.mxu1 %v1470_v1 }
  0x45   : > { %1336 = vmatpush3.bf16.msra.mxu0 %v1436_v36  ;;  %v1459_v36 = vld [vmem:[%s1809_s4 + $0x90] sm:$0xff]  }
  0x46   : > { %1337 = vmatprep.subr.bf16.mxu0 %v1470_v1 }
  0x47   : > { %1356 = vmatpush3.bf16.msra.mxu1 %v1451_v58 }
  0x48   : > { %1357 = vmatprep.subr.bf16.mxu1 %v1470_v1 }
  0x49   : > { %1338 = vmatpush3.bf16.msra.mxu0 %v1437_v40  ;;  %v1461_v40 = vld [vmem:[%s1809_s4 + $0x80] sm:$0xff]  }
  0x4a   : > { %1363 = vmatprep.subr.bf16.mxu0 %v1470_v1 }
  0x4b   : > { %1358 = vmatpush3.bf16.msra.mxu1 %v1453_v60 }
  0x4c   : > { %1340 = vmatmul.mubr.msk.bf16.vlgmr.msra.gmra.mxu0 %vm1666_vm7, %v1153_v43  ;;  %1383 = vmatprep.subr.bf16.mxu1 %v1470_v1 }
  0x4d   : > { %1379 = vmatprep.mubr.msk.bf16.mxu0 %vm1471_vm0, %v1470_v1  ;;  %1364 = vmatpush3.bf16.msra.mxu0 %v1438_v45 }
  0x4e   : > { %1365 = vmatprep.subr.bf16.mxu0 %v1470_v1 }
  0x51   : > { %1366 = vmatpush3.bf16.msra.mxu0 %v1440_v47 }
  0x52   : > { %1367 = vmatprep.subr.bf16.mxu0 %v1470_v1 }
  0x55   : > { %1368 = vmatpush3.bf16.msra.mxu0 %v1442_v49 }
  0x56   : > { %1369 = vmatprep.subr.bf16.mxu0 %v1470_v1 }
  0x59   : > { %1370 = vmatpush3.bf16.msra.mxu0 %v1444_v51 }
  0x5a   : > { %1371 = vmatprep.subr.bf16.mxu0 %v1470_v1 }
  0x5d   : > { %1372 = vmatpush3.bf16.msra.mxu0 %v1446_v53 }
  0x5e   : > { %1373 = vmatprep.subr.bf16.mxu0 %v1470_v1 }
  0x61   : > { %1374 = vmatpush3.bf16.msra.mxu0 %v1448_v55 }
  0x62   : > { %1375 = vmatprep.subr.bf16.mxu0 %v1470_v1 }
  0x65   : > { %1376 = vmatpush3.bf16.msra.mxu0 %v1450_v57 }
  0x66   : > { %1377 = vmatprep.subr.bf16.mxu0 %v1470_v1 }
  0x69   : > { %1378 = vmatpush3.bf16.msra.mxu0 %v1452_v59 }
  0xec   : > { %v444_v61 = vpop.f32.mrf.mxu0 }
  0xed   : > { %v533_v62 = vpop.f32.mrf.mxu1 }
  0xee   : > { %v1301_v63 = vpop.f32.mrf.mxu0  ;;  %v534_v6 = vadd.f32 %v533_v62, %v444_v61 }
  0xef   : > { %v1321_v0 = vpop.f32.mrf.mxu1 }
  0xf0   : > { %v447_v2 = vpop.f32.mrf.mxu0 }
  0xf1   : > { %v536_v3 = vpop.f32.mrf.mxu1 }
  0xf2   : > { %v1302_v4 = vpop.f32.mrf.mxu0  ;;  %v537_v13 = vadd.f32 %v536_v3, %v447_v2 }
  0xf3   : > { %v1322_v5 = vpop.f32.mrf.mxu1 }
 0x10c   : > { %v640_v7 = vpop.f32.mrf.mxu0 }
 0x10d   : > { %v647_v9 = vadd.f32 %v640_v7, %v534_v6 }
 0x10e   : > { %v1341_v12 = vpop.f32.mrf.mxu0 }
 0x10f   : > { %v656_v14 = vmul.f32 %v1155_v8, %v647_v9 }
 0x110   : > { %v643_v15 = vpop.f32.mrf.mxu0 }
 0x111   : > { %v665_v18 = vadd.f32 %v1156_v11, %v656_v14  ;;  %v648_v19 = vadd.f32 %v643_v15, %v537_v13 }
 0x112   : > { %v1342_v20 = vpop.f32.mrf.mxu0 }
 0x113   : > { %v657_v21 = vmul.f32 %v1155_v8, %v648_v19  ;;  %v667_v22 = vmax.f32 %v665_v18, 0.0 }
 0x115   : > { %v666_v23 = vadd.f32 %v1156_v11, %v657_v21  ;;  %v669_v26 = vrot.slane %v667_v22, 7  ;;  %v675_v39 = vrot.slane %v667_v22, 1 }
 0x117   : > { %v668_v25 = vmax.f32 %v666_v23, 0.0 }
 0x119   : > { %v670_v27 = vrot.slane %v668_v25, 7  ;;  %v698_v28 = vpack.c.bf16 %v668_v25, %v667_v22  ;;  %v676_v38 = vrot.slane %v668_v25, 1 }
 0x11b   : > { %1380 = vmatmul.mubr.bf16.vlgmr.msra.gmra.mxu0 %v698_v28  ;;  %v671_v29 = vsel %vm315_vm2, %v669_v26, %v670_v27  ;;  %v672_v30 = vsel %vm315_vm2, %v670_v27, %v669_v26  ;;  %v677_v41 = vsel %vm322_vm5, %v675_v39, %v676_v38  ;;  %v678_v42 = vsel %vm322_vm5, %v676_v38, %v675_v39 }
 0x11c   : > { %v1183_v32 = vpack.c.bf16 %v671_v29, %v672_v30  ;;  %v1219_v43 = vpack.c.bf16 %v678_v42, %v677_v41 }
 0x11e   : > { %1360 = vmatmul.mubr.msk.bf16.vlgmr.msra.gmra.mxu1 %vm1606_vm4, %v1183_v32 }
 0x11f   : > { %1384 = vmatpush3.bf16.msra.mxu1 %v1454_v31  ;;  %1399 = vmatprep.mubr.msk.bf16.mxu1 %vm1471_vm0, %v1470_v1 }
 0x120   : > { %1385 = vmatprep.subr.bf16.mxu1 %v1470_v1 }
 0x123   : > { %1386 = vmatpush3.bf16.msra.mxu1 %v1455_v33 }
 0x124   : > { %1387 = vmatprep.subr.bf16.mxu1 %v1470_v1 }
 0x127   : > { %1388 = vmatpush3.bf16.msra.mxu1 %v1456_v34 }
 0x128   : > { %1389 = vmatprep.subr.bf16.mxu1 %v1470_v1 }
 0x12b   : > { %1390 = vmatpush3.bf16.msra.mxu1 %v1457_v24 }
 0x12c   : > { %1391 = vmatprep.subr.bf16.mxu1 %v1470_v1 }
 0x12f   : > { %1392 = vmatpush3.bf16.msra.mxu1 %v1458_v35 }
 0x130   : > { %1393 = vmatprep.subr.bf16.mxu1 %v1470_v1 }
 0x133   : > { %1394 = vmatpush3.bf16.msra.mxu1 %v1459_v36 }
 0x134   : > { %1395 = vmatprep.subr.bf16.mxu1 %v1470_v1 }
 0x137   : > { %1396 = vmatpush3.bf16.msra.mxu1 %v1460_v37 }
 0x138   : > { %1397 = vmatprep.subr.bf16.mxu1 %v1470_v1 }
 0x13b   : > { %1398 = vmatpush3.bf16.msra.mxu1 %v1461_v40 }
 0x13e   : > { %1400 = vmatmul.mubr.msk.bf16.vlgmr.msra.gmra.mxu1 %vm1666_vm7, %v1219_v43 }
 0x1db   : > { %v887_v45 = vpop.f32.mrf.mxu0 }
 0x1dd   : > { %v1381_v46 = vpop.f32.mrf.mxu0 }
 0x1de   : > { %v798_v47 = vpop.f32.mrf.mxu1 }
 0x1df   : > { %v890_v48 = vpop.f32.mrf.mxu0  ;;  %v888_v52 = vadd.f32 %v887_v45, %v798_v47 }
 0x1e0   : > { %v1361_v49 = vpop.f32.mrf.mxu1 }
 0x1e1   : > { %v1382_v50 = vpop.f32.mrf.mxu0 }
 0x1e2   : > { %v801_v51 = vpop.f32.mrf.mxu1 }
 0x1e3   : > { %v891_v56 = vadd.f32 %v890_v48, %v801_v51 }
 0x1e4   : > { %v1362_v1 = vpop.f32.mrf.mxu1 }
 0x1fe   : > { %v994_v53 = vpop.f32.mrf.mxu1 }
 0x1ff   : > { %v1001_v54 = vadd.f32 %v994_v53, %v888_v52 }
 0x200   : > { %v1401_v55 = vpop.f32.mrf.mxu1 }
 0x201   : > { %v1010_v57 = vmul.f32 %v1221_v10, %v1001_v54 }
 0x202   : > { %v997_v58 = vpop.f32.mrf.mxu1 }
 0x203   : > { %v1019_v59 = vadd.f32 %v1222_v44, %v1010_v57  ;;  %v1002_v60 = vadd.f32 %v997_v58, %v891_v56 }
 0x204   : > { %v1402_v61 = vpop.f32.mrf.mxu1 }
 0x205   : > { %v1021_v62 = vadd.f32 %v1019_v59, %v1582_v16  ;;  %v1011_v63 = vmul.f32 %v1221_v10, %v1002_v60 }
 0x207   : > { %v1023_v0 = vmax.f32 %v1021_v62, 0.0  ;;  %v1020_v2 = vadd.f32 %v1222_v44, %v1011_v63 }
 0x209   : > { %1025 = vst [vmem:[%s278_s12] sm:$0xff] %v1023_v0  ;;  %v1022_v3 = vadd.f32 %v1020_v2, %v1585_v17 }
 0x20b   : > { %v1024_v4 = vmax.f32 %v1022_v3, 0.0 }
 0x20d   : > { %1026 = vst [vmem:[%s278_s12 + $0x8] sm:$0xff] %v1024_v4 }
 0x20e PF: > { %s17_s24 = sadd.s32 1, %s1468_s24  }
 0x20f   : > { %p14_p4 = scmp.ge.s32.totalorder %s17_s24, 4  }
 0x211   :  { %16 = sbr.rel (!%p14_p4) target bundleno = 1 (0x1), region = 82 }

</bundles_post_ra>
